<compile_context>
chip_gen: v6e
topology: v6e:2x2x1
jax: 0.10.0
libtpu: 0.0.40
codegen_flags: <defaults>
</compile_context>

<pallas_src>
import functools

import jax
import jax.numpy as jnp
from jax.experimental import pallas as pl
from jax.experimental.pallas import tpu as pltpu


def _conv1x1_sigmoid_kernel(x_ref, w_ref, b_ref, o_ref):
    # x_ref: (C_in, t_hw)   w_ref: (C_out, C_in)   b_ref: (C_out, 1)
    # o_ref: (C_out, t_hw)
    acc = jnp.dot(w_ref[...], x_ref[...], preferred_element_type=jnp.float32)
    acc = acc + b_ref[...]                     # broadcast bias over lanes
    o_ref[...] = jax.nn.sigmoid(acc).astype(o_ref.dtype)


def shape_prop_weight_regressor(x, weight, bias, *, t_hw=1024):
    """Forward pass equivalent to the PyTorch ShapePropWeightRegressor.

    x:      (N, C_in, H, W)   float32  (NCHW, like PyTorch)
    weight: (C_out, C_in)     float32  (1x1 conv kernel, squeezed)
    bias:   (C_out,)          float32
    returns (N, C_out, H, W)  float32
    """
    n, c_in, h, w = x.shape
    c_out = weight.shape[0]
    hw = h * w

    # Free reshapes only -- no transposes, no padding copies.
    x3 = x.reshape(n, c_in, hw)                # (N, C_in, HW), NCHW-ordered
    b2 = bias.reshape(c_out, 1)                # (C_out, 1), broadcast over lanes

    # Spatial tile: the full HW if it fits in one tile (block dim == array dim
    # is always legal), otherwise a multiple of 128 lanes; any ragged final
    # block is handled by Pallas with masked boundary loads/stores.
    t = min(t_hw, hw)
    if t < hw:
        t = max(128, (t // 128) * 128)
    grid = (n, pl.cdiv(hw, t))

    out = pl.pallas_call(
        _conv1x1_sigmoid_kernel,
        out_shape=jax.ShapeDtypeStruct((n, c_out, hw), x.dtype),
        grid_spec=pltpu.PrefetchScalarGridSpec(
            num_scalar_prefetch=0,
            grid=grid,
            in_specs=[
                # activation tile: batch squeezed, channels on sublanes,
                # spatial on lanes
                pl.BlockSpec((None, c_in, t), lambda b, j: (b, 0, j)),
                # full weight, VMEM-resident across all grid steps
                pl.BlockSpec((c_out, c_in), lambda b, j: (0, 0)),
                # full bias, VMEM-resident across all grid steps
                pl.BlockSpec((c_out, 1), lambda b, j: (0, 0)),
            ],
            # lane-dense output block: (C_out, t) with t a multiple of 128
            out_specs=pl.BlockSpec((None, c_out, t), lambda b, j: (b, 0, j)),
        ),
        compiler_params=pltpu.CompilerParams(
            dimension_semantics=("parallel", "parallel")),
    )(x3, weight, b2)

    return out.reshape(n, c_out, h, w)         # free reshape back to NCHW


def _reference(x, weight, bias):
    # Pure-JAX reference: 1x1 conv + sigmoid in NCHW.
    y = jnp.einsum("nchw,oc->nohw", x, weight) + bias[None, :, None, None]
    return jax.nn.sigmoid(y)


if __name__ == "__main__":
    # Small shapes consistent with the module.
    batch, in_channels, spatial = 2, 4, 16
    latent_dim = 8
    out_channels = latent_dim * 9                 # 72

    key = jax.random.PRNGKey(0)
    kx, kw, kb = jax.random.split(key, 3)

    x = jax.random.normal(kx, (batch, in_channels, spatial, spatial),
                          dtype=jnp.float32)

    # Deterministic parameter init mimicking PyTorch Conv2d defaults
    # (kaiming-uniform-ish bounds for a 1x1 conv): U(-1/sqrt(fan_in), +).
    bound = 1.0 / (in_channels ** 0.5)
    weight = jax.random.uniform(kw, (out_channels, in_channels),
                                minval=-bound, maxval=bound,
                                dtype=jnp.float32)
    bias = jax.random.uniform(kb, (out_channels,),
                              minval=-bound, maxval=bound, dtype=jnp.float32)

    fwd = jax.jit(functools.partial(shape_prop_weight_regressor, t_hw=1024))
    y = fwd(x, weight, bias)
    jax.block_until_ready(y)

    y_ref = _reference(x, weight, bias)
    assert y.shape == (batch, out_channels, spatial, spatial)
    assert jnp.allclose(y, y_ref, atol=1e-5, rtol=1e-5)

    print("KERNEL_OK")
</pallas_src>

<mosaic_0001>
module attributes {stable_mosaic.version = 11 : i64} {
  func.func @_conv1x1_sigmoid_kernel(%arg0: i32, %arg1: i32, %arg2: memref<1x4x256xf32, #tpu.memory_space<vmem>>, %arg3: memref<72x4xf32, #tpu.memory_space<vmem>>, %arg4: memref<72x1xf32, #tpu.memory_space<vmem>>, %arg5: memref<1x72x256xf32, #tpu.memory_space<vmem>>) attributes {dimension_semantics = [#tpu.dimension_semantics<parallel>, #tpu.dimension_semantics<parallel>], iteration_bounds = array<i64: 2, 1>, scalar_prefetch = 0 : i64, scratch_operands = 0 : i64, tpu.core_type = #tpu.core_type<tc>, window_params = [{transform_indices = @transform_0, window_bounds = array<i64: 1, 4, 256>}, {pipeline_mode = #tpu.pipeline_mode<synchronous>, transform_indices = @transform_1, window_bounds = array<i64: 72, 4>}, {pipeline_mode = #tpu.pipeline_mode<synchronous>, transform_indices = @transform_2, window_bounds = array<i64: 72, 1>}, {transform_indices = @transform_3, window_bounds = array<i64: 1, 72, 256>}]} {
    %c0 = arith.constant 0 : index
    %c0_0 = arith.constant 0 : index
    %0 = vector.load %arg3[%c0, %c0_0] : memref<72x4xf32, #tpu.memory_space<vmem>>, vector<72x4xf32>
    %c0_1 = arith.constant 0 : index
    %c0_2 = arith.constant 0 : index
    %c0_3 = arith.constant 0 : index
    %1 = vector.load %arg2[%c0_1, %c0_2, %c0_3] : memref<1x4x256xf32, #tpu.memory_space<vmem>>, vector<1x4x256xf32>
    %2 = vector.shape_cast %1 : vector<1x4x256xf32> to vector<4x256xf32>
    %cst = arith.constant dense<0.000000e+00> : vector<72x256xf32>
    %3 = tpu.matmul %0, %2, %cst {dimension_numbers = #tpu.dot_dimension_numbers<[1], [0], [0], [1], [0, 0, 1, 1], [], []>} : vector<72x4xf32>, vector<4x256xf32>, vector<72x256xf32> -> vector<72x256xf32>
    %c0_4 = arith.constant 0 : index
    %c0_5 = arith.constant 0 : index
    %4 = vector.load %arg4[%c0_4, %c0_5] : memref<72x1xf32, #tpu.memory_space<vmem>>, vector<72x1xf32>
    %5 = vector.broadcast %4 : vector<72x1xf32> to vector<72x256xf32>
    %6 = arith.addf %3, %5 : vector<72x256xf32>
    %7 = arith.negf %6 : vector<72x256xf32>
    %8 = math.exp %7 : vector<72x256xf32>
    %cst_6 = arith.constant 1.000000e+00 : f32
    %9 = vector.broadcast %cst_6 : f32 to vector<72x256xf32>
    %10 = arith.addf %9, %8 : vector<72x256xf32>
    %11 = arith.divf %9, %10 : vector<72x256xf32>
    %c0_7 = arith.constant 0 : index
    %c0_8 = arith.constant 0 : index
    %c0_9 = arith.constant 0 : index
    %12 = vector.load %arg5[%c0_7, %c0_8, %c0_9] : memref<1x72x256xf32, #tpu.memory_space<vmem>>, vector<1x72x256xf32>
    %13 = vector.shape_cast %12 : vector<1x72x256xf32> to vector<72x256xf32>
    %14 = vector.shape_cast %11 : vector<72x256xf32> to vector<1x72x256xf32>
    tpu.vector_store %arg5[%c0_7, %c0_8, %c0_9], %14 {strides = array<i32>} : memref<1x72x256xf32, #tpu.memory_space<vmem>>, vector<1x72x256xf32>,
    return
  }
  func.func @transform_0(%arg0: i32, %arg1: i32) -> (i32, i32, i32) {
    %c0_i32 = arith.constant 0 : i32
    %c0_i32_0 = arith.constant 0 : i32
    return %arg0, %c0_i32, %arg1 : i32, i32, i32
  }
  func.func @transform_1(%arg0: i32, %arg1: i32) -> (i32, i32) {
    %c0_i32 = arith.constant 0 : i32
    %c0_i32_0 = arith.constant 0 : i32
    %c0_i32_1 = arith.constant 0 : i32
    return %c0_i32, %c0_i32_0 : i32, i32
  }
  func.func @transform_2(%arg0: i32, %arg1: i32) -> (i32, i32) {
    %c0_i32 = arith.constant 0 : i32
    %c0_i32_0 = arith.constant 0 : i32
    %c0_i32_1 = arith.constant 0 : i32
    return %c0_i32, %c0_i32_0 : i32, i32
  }
  func.func @transform_3(%arg0: i32, %arg1: i32) -> (i32, i32, i32) {
    %c0_i32 = arith.constant 0 : i32
    %c0_i32_0 = arith.constant 0 : i32
    return %arg0, %c0_i32, %arg1 : i32, i32, i32
  }
}

</mosaic_0001>

<bundles_post_ra>
// kernel: shape_prop_weight_regressor.1
= control target key start
LH: loop header
LB: loop body
LE: loop exit
PB: predicated region body
PF: predicated region fallthrough
CT: control target
= control target key end

     0   :  { %s831_s12 = smov 0   ;;  %s833_s13 = smov 0   ;;  %s955_s0 = inlined_call_operand.vmem [shape: f32[2,4,256], index: 0, kind: input, shape index: {}]   ;;  %s956_s1 = inlined_call_operand.vmem [shape: f32[72,4], index: 1, kind: input, shape index: {}]   ;;  %s957_s2 = inlined_call_operand.vmem [shape: f32[72,1], index: 2, kind: input, shape index: {}]   ;;  %s958_s3 = inlined_call_operand.vmem [shape: f32[2,72,256], index: 3, kind: output, shape index: {}]  }
   0x1   :  { %s835_s14 = smov 0  }
   0x2 LB: > { %s25_s15 = sadd.s32 1, %s803_s13  ;;  %p645_p0 = scmp.ge.s32.totalorder %s807_s14, 1  ;;  %s807_s14 = sphi %s835_s14, %s13_s14   ;;  %s803_s13 = sphi %s833_s13, %s960_s13   ;;  %s799_s12 = sphi %s831_s12, %s959_s12  }
   0x3   : > { %p27_p1 = scmp.ge.s32.totalorder %s25_s15, 2  ;;  %p158_p2 = scmp.lt.s32.totalorder %s807_s14, 3 }
   0x5   : > { %s962_s15 = smov (%p27_p1, %s25_s15), 0  ;;  %p159_p3 = pnand %p645_p0, %p158_p2 }
   0x6   : > { %p191_p4 = scmp.lt.s32.totalorder (!%p159_p3), %s799_s12, 1 }
   0x7   : > { %162 = sbr.rel (%p159_p3) target bundleno = 281 (0x119), region = 32 }
   0xc   : > { %v809_v0 = vmov 0.0   ;;  %s964_s12 = smov (!%p191_p4, %s799_s12), 1  ;;  %v810_v1 = vmov 0   ;;  %v220_v2 = vld [vmem:[%s957_s2] sm:$0xff]  ;;  %v222_v3 = vld [vmem:[%s957_s2 + $0x10] sm:$0xff]  ;;  %v221_v4 = vld [vmem:[%s957_s2 + $0x8] sm:$0xff] }
   0xd   : > { %373 = vmatprep.mubr.f32.mxu0 %v809_v0  ;;  %403 = vmatprep.mubr.f32.mxu1 %v809_v0  ;;  %s680_s18 = sshll.u32 %s964_s12, 3  ;;  %vm304_vm0 = vcmask 1043456   ;;  %v210_v7 = vld [vmem:[%s956_s1] sm:$0xff]  ;;  %vm276_vm1 = vcmask 31744   ;;  %v215_v8 = vld [vmem:[%s956_s1 + $0x28] sm:$0xff]  ;;  %v223_v10 = vld [vmem:[%s957_s2 + $0x18] sm:$0xff] }
   0xe   : > { %710 = vset.pattern.permute.xlu0 %v810_v1  ;;  %711 = vset.pattern.permute.xlu1 %v810_v1  ;;  %s198_s23 = scalar_lea.vmem %s955_s0, %s680_s18  ;;  %v224_v9 = vld [vmem:[%s957_s2 + $0x20] sm:$0xff]  ;;  %v211_v11 = vld [vmem:[%s956_s1 + $0x8] sm:$0xff]  ;;  %v216_v12 = vld [vmem:[%s956_s1 + $0x30] sm:$0xff]  ;;  %s683_s6 = smul.u32 144, %s964_s12 }
   0xf   : > { %231 = vperm.xlu0 %710, %v220_v2   ;;  %241 = vperm.xlu1 %711, %v222_v3   ;;  %v219_v5 = vld [vmem:[%s198_s23] sm:$0xff]  ;;  %v226_v13 = vld [vmem:[%s957_s2 + $0x30] sm:$0xff]  ;;  %v225_v14 = vld [vmem:[%s957_s2 + $0x28] sm:$0xff] }
  0x10   : > { %v275_v6 = vcombine.high %v219_v5, %v219_v5  ;;  %v212_v15 = vld [vmem:[%s956_s1 + $0x10] sm:$0xff]  ;;  %v217_v16 = vld [vmem:[%s956_s1 + $0x38] sm:$0xff]  ;;  %v228_v17 = vld [vmem:[%s957_s2 + $0x40] sm:$0xff]  ;;  %s926_s12 = scalar_lea.vmem %s958_s3, %s683_s6 }
  0x11   : > { %v227_v18 = vld [vmem:[%s957_s2 + $0x38] sm:$0xff]  ;;  %v218_v20 = vld [vmem:[%s956_s1 + $0x40] sm:$0xff] }
  0x12   : > { %649 = vmatprep.subr.msk.mxu0 %vm304_vm0, %v275_v6  ;;  %681 = vmatprep.subr.msk.mxu1 %vm304_vm0, %v275_v6  ;;  %v213_v19 = vld [vmem:[%s956_s1 + $0x18] sm:$0xff]  ;;  %v214_v21 = vld [vmem:[%s956_s1 + $0x20] sm:$0xff] }
  0x13   : > { %236 = vperm.xlu0 %710, %v221_v4   ;;  %650 = vmatpush1.msk.msra.mxu0 %vm304_vm0, %v219_v5 }
  0x14   : > { %682 = vmatpush1.msk.msra.mxu1 %vm304_vm0, %v219_v5  ;;  %651 = vmatmul.mubr.msk.f32.vlgmr.msra.gmra.mxu0 %vm276_vm1, %v210_v7 }
  0x15   : > { %656 = vmatmul.mubr.msk.f32.vlgmr.msra.gmra.mxu1 %vm276_vm1, %v215_v8  ;;  %379 = vmatprep.mubr.f32.mxu0 %v809_v0 }
  0x16   : > { %409 = vmatprep.mubr.f32.mxu1 %v809_v0  ;;  %246 = vperm.xlu1 %711, %v223_v10  }
  0x17   : > { %251 = vperm.xlu0 %710, %v224_v9  }
  0x18   : > { %652 = vmatmul.mubr.msk.f32.gmra.mxu0 %vm276_vm1, %v211_v11 }
  0x19   : > { %657 = vmatmul.mubr.msk.f32.gmra.mxu1 %vm276_vm1, %v216_v12  ;;  %385 = vmatprep.mubr.f32.mxu0 %v809_v0 }
  0x1a   : > { %415 = vmatprep.mubr.f32.mxu1 %v809_v0  ;;  %256 = vperm.xlu1 %711, %v225_v14  }
  0x1b   : > { %261 = vperm.xlu0 %710, %v226_v13  }
  0x1c   : > { %653 = vmatmul.mubr.msk.f32.gmra.mxu0 %vm276_vm1, %v212_v15 }
  0x1d   : > { %658 = vmatmul.mubr.msk.f32.gmra.mxu1 %vm276_vm1, %v217_v16  ;;  %391 = vmatprep.mubr.f32.mxu0 %v809_v0 }
  0x1e   : > { %421 = vmatprep.mubr.f32.mxu1 %v809_v0  ;;  %266 = vperm.xlu1 %711, %v227_v18  }
  0x1f   : > { %271 = vperm.xlu0 %710, %v228_v17  }
  0x20   : > { %654 = vmatmul.mubr.msk.f32.gmra.mxu0 %vm276_vm1, %v213_v19 }
  0x21   : > { %659 = vmatmul.mubr.msk.f32.gmra.mxu1 %vm276_vm1, %v218_v20  ;;  %397 = vmatprep.mubr.f32.mxu0 %v809_v0 }
  0x24   : > { %655 = vmatmul.mubr.msk.f32.gmra.mxu0 %vm276_vm1, %v214_v21 }
  0x8a   : > { %v232_v22 = vpop.permute.xlu0 %231  ;;  %v242_v23 = vpop.permute.xlu1 %241 }
  0x8e   : > { %v237_v24 = vpop.permute.xlu0 %236 }
  0x91   : > { %v247_v25 = vpop.permute.xlu1 %246 }
  0x92   : > { %v918_v26 = vpop.permute.xlu0 %251 }
  0x95   : > { %v257_v27 = vpop.permute.xlu1 %256 }
  0x96   : > { %v262_v40 = vpop.permute.xlu0 %261 }
  0x99   : > { %v267_v53 = vpop.permute.xlu1 %266 }
  0x9a   : > { %v272_v2 = vpop.permute.xlu0 %271 }
  0xd4   : > { %v375_v28 = vpop.f32.mrf.mxu0 }
  0xd5   : > { %v405_v29 = vpop.f32.mrf.mxu1  ;;  %v376_v30 = vadd.f32 %v375_v28, %v232_v22 }
  0xd6   : > { %v406_v31 = vadd.f32 %v405_v29, %v257_v27  ;;  %v377_v32 = vpop.f32.mrf.mxu0 }
  0xd7   : > { %v407_v33 = vpop.f32.mrf.mxu1  ;;  %v660_v34 = vmul.f32 -1.442695, %v376_v30  ;;  %v378_v36 = vadd.f32 %v377_v32, %v232_v22 }
  0xd8   : > { %v670_v35 = vmul.f32 -1.442695, %v406_v31  ;;  %v408_v37 = vadd.f32 %v407_v33, %v257_v27  ;;  %v381_v38 = vpop.f32.mrf.mxu0 }
  0xd9   : > { %v411_v39 = vpop.f32.mrf.mxu1  ;;  %713 = vpow2.f32 %v660_v34  ;;  %v661_v41 = vmul.f32 -1.442695, %v378_v36  ;;  %v382_v43 = vadd.f32 %v381_v38, %v237_v24 }
  0xda   : > { %v671_v42 = vmul.f32 -1.442695, %v408_v37  ;;  %715 = vpow2.f32 %v670_v35  ;;  %v412_v44 = vadd.f32 %v411_v39, %v262_v40  ;;  %v383_v45 = vpop.f32.mrf.mxu0 }
  0xdb   : > { %v413_v46 = vpop.f32.mrf.mxu1  ;;  %717 = vpow2.f32 %v661_v41  ;;  %v662_v47 = vmul.f32 -1.442695, %v382_v43  ;;  %v384_v48 = vadd.f32 %v383_v45, %v237_v24 }
  0xdc   : > { %v414_v49 = vadd.f32 %v413_v46, %v262_v40  ;;  %719 = vpow2.f32 %v671_v42  ;;  %v672_v50 = vmul.f32 -1.442695, %v412_v44  ;;  %v387_v51 = vpop.f32.mrf.mxu0 }
  0xdd   : > { %v417_v52 = vpop.f32.mrf.mxu1  ;;  %721 = vpow2.f32 %v662_v47  ;;  %v663_v54 = vmul.f32 -1.442695, %v384_v48  ;;  %v388_v56 = vadd.f32 %v387_v51, %v242_v23 }
  0xde   : > { %v673_v55 = vmul.f32 -1.442695, %v414_v49  ;;  %723 = vpow2.f32 %v672_v50  ;;  %v418_v57 = vadd.f32 %v417_v52, %v267_v53  ;;  %v389_v58 = vpop.f32.mrf.mxu0 }
  0xdf   : > { %v419_v59 = vpop.f32.mrf.mxu1  ;;  %725 = vpow2.f32 %v663_v54  ;;  %v664_v60 = vmul.f32 -1.442695, %v388_v56  ;;  %v390_v61 = vadd.f32 %v389_v58, %v242_v23 }
  0xe0   : > { %v420_v62 = vadd.f32 %v419_v59, %v267_v53  ;;  %727 = vpow2.f32 %v673_v55  ;;  %v674_v63 = vmul.f32 -1.442695, %v418_v57  ;;  %v393_v0 = vpop.f32.mrf.mxu0 }
  0xe1   : > { %v423_v1 = vpop.f32.mrf.mxu1  ;;  %729 = vpow2.f32 %v664_v60  ;;  %v665_v3 = vmul.f32 -1.442695, %v390_v61  ;;  %v394_v5 = vadd.f32 %v393_v0, %v247_v25 }
  0xe2   : > { %v675_v4 = vmul.f32 -1.442695, %v420_v62  ;;  %731 = vpow2.f32 %v674_v63  ;;  %v424_v6 = vadd.f32 %v423_v1, %v272_v2  ;;  %v395_v7 = vpop.f32.mrf.mxu0 }
  0xe3   : > { %v425_v8 = vpop.f32.mrf.mxu1  ;;  %733 = vpow2.f32 %v665_v3  ;;  %v666_v9 = vmul.f32 -1.442695, %v394_v5  ;;  %v396_v10 = vadd.f32 %v395_v7, %v247_v25 }
  0xe4   : > { %v426_v11 = vadd.f32 %v425_v8, %v272_v2  ;;  %735 = vpow2.f32 %v675_v4  ;;  %v676_v12 = vmul.f32 -1.442695, %v424_v6  ;;  %v399_v27 = vpop.f32.mrf.mxu0 }
  0xe5   : > { %737 = vpow2.f32 %v666_v9  ;;  %v667_v13 = vmul.f32 -1.442695, %v396_v10  ;;  %v400_v41 = vadd.f32 %v399_v27, %v918_v26 }
  0xe6   : > { %v677_v14 = vmul.f32 -1.442695, %v426_v11  ;;  %v714_v15 = vpop.eup %713  ;;  %739 = vpow2.f32 %v676_v12  ;;  %v401_v36 = vpop.f32.mrf.mxu0 }
  0xe7   : > { %v716_v16 = vpop.eup %715  ;;  %v482_v17 = vadd.f32 1.0, %v714_v15  ;;  %741 = vpow2.f32 %v667_v13  ;;  %v402_v44 = vadd.f32 %v401_v36, %v918_v26  ;;  %v668_v51 = vmul.f32 -1.442695, %v400_v41 }
  0xe8   : > { %v718_v18 = vpop.eup %717  ;;  %v492_v19 = vadd.f32 1.0, %v716_v16  ;;  %743 = vpow2.f32 %v677_v14 }
  0xe9   : > { %v720_v20 = vpop.eup %719  ;;  %745 = vrcp.f32 %v482_v17  ;;  %v483_v21 = vadd.f32 1.0, %v718_v18  ;;  %v669_v53 = vmul.f32 -1.442695, %v402_v44 }
  0xea   : > { %v722_v22 = vpop.eup %721  ;;  %747 = vrcp.f32 %v492_v19  ;;  %v493_v23 = vadd.f32 1.0, %v720_v20 }
  0xeb   : > { %v724_v24 = vpop.eup %723  ;;  %749 = vrcp.f32 %v483_v21  ;;  %v484_v25 = vadd.f32 1.0, %v722_v22 }
  0xec   : > { %v726_v28 = vpop.eup %725  ;;  %751 = vrcp.f32 %v493_v23  ;;  %v494_v29 = vadd.f32 1.0, %v724_v24 }
  0xed   : > { %v728_v30 = vpop.eup %727  ;;  %753 = vrcp.f32 %v484_v25  ;;  %v485_v31 = vadd.f32 1.0, %v726_v28 }
  0xee   : > { %v730_v32 = vpop.eup %729  ;;  %755 = vrcp.f32 %v494_v29  ;;  %v495_v33 = vadd.f32 1.0, %v728_v30 }
  0xef   : > { %v732_v34 = vpop.eup %731  ;;  %757 = vrcp.f32 %v485_v31  ;;  %v486_v35 = vadd.f32 1.0, %v730_v32 }
  0xf0   : > { %v734_v37 = vpop.eup %733  ;;  %759 = vrcp.f32 %v495_v33  ;;  %v496_v38 = vadd.f32 1.0, %v732_v34 }
  0xf1   : > { %v736_v39 = vpop.eup %735  ;;  %761 = vrcp.f32 %v486_v35  ;;  %v487_v40 = vadd.f32 1.0, %v734_v37 }
  0xf2   : > { %v738_v42 = vpop.eup %737  ;;  %763 = vrcp.f32 %v496_v38  ;;  %v497_v43 = vadd.f32 1.0, %v736_v39 }
  0xf3   : > { %v740_v45 = vpop.eup %739  ;;  %765 = vrcp.f32 %v487_v40  ;;  %v488_v46 = vadd.f32 1.0, %v738_v42 }
  0xf4   : > { %v742_v47 = vpop.eup %741  ;;  %767 = vrcp.f32 %v497_v43  ;;  %v498_v48 = vadd.f32 1.0, %v740_v45 }
  0xf5   : > { %v744_v49 = vpop.eup %743  ;;  %769 = vrcp.f32 %v488_v46  ;;  %v489_v50 = vadd.f32 1.0, %v742_v47 }
  0xf6   : > { %v746_v26 = vpop.eup %745  ;;  %771 = vrcp.f32 %v498_v48  ;;  %v499_v52 = vadd.f32 1.0, %v744_v49 }
  0xf7   : > { %v748_v54 = vpop.eup %747  ;;  %536 = vst [vmem:[%s926_s12] sm:$0xff] %v746_v26  ;;  %773 = vrcp.f32 %v489_v50 }
  0xf8   : > { %v750_v55 = vpop.eup %749  ;;  %546 = vst [vmem:[%s926_s12 + $0x50] sm:$0xff] %v748_v54  ;;  %775 = vrcp.f32 %v499_v52 }
  0xf9   : > { %v752_v56 = vpop.eup %751  ;;  %537 = vst [vmem:[%s926_s12 + $0x8] sm:$0xff] %v750_v55  ;;  %777 = vpow2.f32 %v668_v51 }
  0xfa   : > { %v754_v57 = vpop.eup %753  ;;  %547 = vst [vmem:[%s926_s12 + $0x58] sm:$0xff] %v752_v56  ;;  %779 = vpow2.f32 %v669_v53 }
  0xfb   : > { %v756_v58 = vpop.eup %755  ;;  %538 = vst [vmem:[%s926_s12 + $0x10] sm:$0xff] %v754_v57 }
  0xfc   : > { %v758_v59 = vpop.eup %757  ;;  %548 = vst [vmem:[%s926_s12 + $0x60] sm:$0xff] %v756_v58 }
  0xfd   : > { %v760_v60 = vpop.eup %759  ;;  %539 = vst [vmem:[%s926_s12 + $0x18] sm:$0xff] %v758_v59 }
  0xfe   : > { %v762_v61 = vpop.eup %761  ;;  %549 = vst [vmem:[%s926_s12 + $0x68] sm:$0xff] %v760_v60 }
  0xff   : > { %v764_v62 = vpop.eup %763  ;;  %540 = vst [vmem:[%s926_s12 + $0x20] sm:$0xff] %v762_v61 }
 0x100   : > { %v766_v63 = vpop.eup %765  ;;  %550 = vst [vmem:[%s926_s12 + $0x70] sm:$0xff] %v764_v62 }
 0x101   : > { %v768_v0 = vpop.eup %767  ;;  %541 = vst [vmem:[%s926_s12 + $0x28] sm:$0xff] %v766_v63 }
 0x102   : > { %v770_v1 = vpop.eup %769  ;;  %551 = vst [vmem:[%s926_s12 + $0x78] sm:$0xff] %v768_v0 }
 0x103   : > { %v772_v2 = vpop.eup %771  ;;  %542 = vst [vmem:[%s926_s12 + $0x30] sm:$0xff] %v770_v1 }
 0x104   : > { %v774_v3 = vpop.eup %773  ;;  %552 = vst [vmem:[%s926_s12 + $0x80] sm:$0xff] %v772_v2 }
 0x105   : > { %v776_v4 = vpop.eup %775  ;;  %543 = vst [vmem:[%s926_s12 + $0x38] sm:$0xff] %v774_v3 }
 0x106   : > { %v778_v5 = vpop.eup %777  ;;  %553 = vst [vmem:[%s926_s12 + $0x88] sm:$0xff] %v776_v4 }
 0x107   : > { %v780_v6 = vpop.eup %779  ;;  %v490_v7 = vadd.f32 1.0, %v778_v5 }
 0x108   : > { %v491_v8 = vadd.f32 1.0, %v780_v6 }
 0x109   : > { %781 = vrcp.f32 %v490_v7 }
 0x10a   : > { %783 = vrcp.f32 %v491_v8 }
 0x116   : > { %v782_v9 = vpop.eup %781 }
 0x117   : > { %v784_v10 = vpop.eup %783  ;;  %544 = vst [vmem:[%s926_s12 + $0x40] sm:$0xff] %v782_v9 }
 0x118   : > { %545 = vst [vmem:[%s926_s12 + $0x48] sm:$0xff] %v784_v10 }
 0x119 PF: > { %s13_s14 = sadd.s32 1, %s807_s14   ;;  %s959_s12 = smov %s803_s13 }
 0x11a   : > { %p10_p5 = scmp.ge.s32.totalorder %s13_s14, 4   ;;  %s960_s13 = smov %s962_s15 }
 0x11c   :  { %12 = sbr.rel (!%p10_p5) target bundleno = 2 (0x2), region = 62 }

</bundles_post_ra>
